<compile_context>
chip_gen: v7x
topology: tpu7x:2x2x1
jax: 0.10.0
libtpu: 0.0.40
codegen_flags: <defaults>
</compile_context>

<pallas_src>
import math

import jax
import jax.numpy as jnp
from jax.experimental import pallas as pl
from jax.experimental.pallas import tpu as pltpu


def _round_up(n, m):
    return ((n + m - 1) // m) * m


def flow_matching_kernel(
    xt_ref, freq_ref,
    w_proj_ref, b_proj_ref,
    w_time_ref,
    w_h_ref, b_h_ref,
    w_out_ref, b_out_ref,
    o_ref,
):
    xt = xt_ref[...]                       # [TB, Din] f32; lane 0 carries t
    wdt = w_proj_ref.dtype

    # --- projection + ReLU (t lane hits a zero weight row -> no effect) ---
    h = jnp.dot(xt.astype(wdt), w_proj_ref[...],
                preferred_element_type=jnp.float32)
    h = jnp.maximum(h + b_proj_ref[...], 0.0)                   # [TB, Hp]

    # --- sinusoidal time embedding (half-width) + fused time projection ---
    t = xt[:, 0:1]                                              # [TB, 1]
    a = t * freq_ref[...]                                       # [TB, Fp]
    sc = jnp.concatenate([jnp.sin(a), jnp.cos(a)], axis=-1)     # [TB, 2*Fp]
    h = h + jnp.dot(sc.astype(wdt), w_time_ref[...],
                    preferred_element_type=jnp.float32)
    # (b_time is folded into b_h in the wrapper)

    # --- hidden layer (Linear + ReLU) ---
    h = jnp.dot(h.astype(wdt), w_h_ref[...],
                preferred_element_type=jnp.float32)
    h = jnp.maximum(h + b_h_ref[...], 0.0)

    # --- output layer ---
    out = jnp.dot(h.astype(wdt), w_out_ref[...],
                  preferred_element_type=jnp.float32)
    o_ref[...] = out + b_out_ref[...]                           # [TB, Dout]


def flow_matching_forward(x, t, params, *, batch_tile=None,
                          weight_dtype=jnp.float32):
    """x: [B, data_dim] f32, t: [B] f32, params: weights [in,out] / biases [1,out]."""
    B, data_dim = x.shape
    hidden_dim = params["w_proj"].shape[1]
    half_dim = hidden_dim // 2              # module requires even hidden_dim

    LANE = 128
    Din = _round_up(data_dim + 1, LANE)     # +1 lane carries t (lane 0)
    Dout = _round_up(data_dim, LANE)        # lane-dense output slab
    Hp = _round_up(hidden_dim, LANE)        # padded hidden dim
    Fp = _round_up(half_dim, LANE)          # padded half (frequency) dim

    # Batch tile: multiple of 8 sublanes (f32); large enough to feed the
    # 256-wide MXU, and >= 2 grid steps when possible (v7x megacore sharding).
    b8 = _round_up(B, 8)
    if batch_tile is None:
        TB = min(512, b8)
        if b8 > 8 and b8 // TB < 2:
            TB = _round_up((b8 + 1) // 2, 8)
    else:
        TB = batch_tile
    Bp = _round_up(B, TB)

    # --- precompute / pad (glue, runs as regular XLA ops) ---
    denom = max(half_dim - 1, 1)            # guard hidden_dim == 2
    freqs = jnp.exp(jnp.arange(half_dim, dtype=jnp.float32)
                    * (-math.log(10000.0) / denom))
    freqs_p = jnp.zeros((1, Fp), jnp.float32).at[0, :half_dim].set(freqs)

    # x slab with t stashed in lane 0 (zero padding keeps results exact).
    xt_p = jnp.zeros((Bp, Din), jnp.float32)
    xt_p = xt_p.at[:B, 0].set(t.astype(jnp.float32))
    xt_p = xt_p.at[:B, 1:1 + data_dim].set(x.astype(jnp.float32))

    def padw(a, r, c, dtype):
        out = jnp.zeros((r, c), jnp.float32)
        out = out.at[:a.shape[0], :a.shape[1]].set(a.astype(jnp.float32))
        return out.astype(dtype)

    # Projection weight shifted down by one row (row 0 = t lane = zeros).
    w_proj = jnp.zeros((Din, Hp), jnp.float32)
    w_proj = w_proj.at[1:1 + data_dim, :hidden_dim].set(params["w_proj"])
    w_proj = w_proj.astype(weight_dtype)
    b_proj = padw(params["b_proj"], 1, Hp, jnp.float32)

    # Fused sin/cos time-projection weight: rows [0:half) feed sin lanes,
    # rows [Fp:Fp+half) feed cos lanes.
    w_time = jnp.zeros((2 * Fp, Hp), jnp.float32)
    w_time = w_time.at[:half_dim, :hidden_dim].set(params["w_time"][0::2, :])
    w_time = w_time.at[Fp:Fp + half_dim, :hidden_dim].set(
        params["w_time"][1::2, :])
    w_time = w_time.astype(weight_dtype)

    # Fold b_time into the hidden-layer bias:
    #   (h + te + b_time) @ W_h + b_h == (h + te) @ W_h + (b_h + b_time @ W_h)
    b_h_eff = params["b_h"] + params["b_time"] @ params["w_h"]
    w_h = padw(params["w_h"], Hp, Hp, weight_dtype)
    b_h = padw(b_h_eff, 1, Hp, jnp.float32)
    w_out = padw(params["w_out"], Hp, Dout, weight_dtype)
    b_out = padw(params["b_out"], 1, Dout, jnp.float32)

    grid = (Bp // TB,)

    def resident(shape):
        # Weights/biases never change across grid steps -> single buffer.
        return pl.BlockSpec(shape, lambda i: (0, 0),
                            pipeline_mode=pl.Buffered(1))

    in_specs = [
        pl.BlockSpec((TB, Din), lambda i: (i, 0)),     # streamed x (+t lane)
        resident((1, Fp)),                             # freqs
        resident((Din, Hp)), resident((1, Hp)),        # projection
        resident((2 * Fp, Hp)),                        # fused time projection
        resident((Hp, Hp)), resident((1, Hp)),         # hidden layer
        resident((Hp, Dout)), resident((1, Dout)),     # output layer
    ]
    out_spec = pl.BlockSpec((TB, Dout), lambda i: (i, 0))

    inputs = (xt_p, freqs_p, w_proj, b_proj, w_time, w_h, b_h, w_out, b_out)

    # Explicit VMEM budget: residents x 1 buffer + double-buffered in/out.
    wbytes = jnp.dtype(weight_dtype).itemsize
    resident_bytes = (Fp * 4
                      + (Din * Hp + 2 * Fp * Hp + Hp * Hp + Hp * Dout) * wbytes
                      + (3 * Hp + Dout) * 4)
    streamed_bytes = 2 * (TB * Din * 4 + TB * Dout * 4)
    vmem_limit = min(128 << 20,
                     int(1.5 * (resident_bytes + streamed_bytes)) + (2 << 20))

    flops = 2 * Bp * (Din * Hp + 2 * Fp * Hp + Hp * Hp + Hp * Dout)
    transcendentals = 2 * Bp * Fp
    bytes_accessed = int(resident_bytes + Bp * (Din + Dout) * 4)

    out_pad = pl.pallas_call(
        flow_matching_kernel,
        out_shape=jax.ShapeDtypeStruct((Bp, Dout), jnp.float32),
        grid=grid,
        in_specs=in_specs,
        out_specs=out_spec,
        compiler_params=pltpu.CompilerParams(
            dimension_semantics=("parallel",),
            vmem_limit_bytes=vmem_limit),
        cost_estimate=pl.CostEstimate(
            flops=flops,
            transcendentals=transcendentals,
            bytes_accessed=bytes_accessed),
    )(*inputs)

    return out_pad[:B, :data_dim]


def init_params(key, data_dim, hidden_dim):
    """Deterministic synthetic parameters. Weights stored as [in, out]."""
    ks = jax.random.split(key, 8)

    def w(k, shape):
        return jax.random.normal(k, shape, jnp.float32) * 0.1

    return {
        "w_proj": w(ks[0], (data_dim, hidden_dim)),
        "b_proj": w(ks[1], (1, hidden_dim)),
        "w_time": w(ks[2], (hidden_dim, hidden_dim)),
        "b_time": w(ks[3], (1, hidden_dim)),
        "w_h":    w(ks[4], (hidden_dim, hidden_dim)),
        "b_h":    w(ks[5], (1, hidden_dim)),
        "w_out":  w(ks[6], (hidden_dim, data_dim)),
        "b_out":  w(ks[7], (1, data_dim)),
    }


def reference_forward(x, t, params, hidden_dim):
    """Pure-JAX reference mirroring the PyTorch module (num_hidden_layers=1)."""
    half_dim = hidden_dim // 2
    denom = max(half_dim - 1, 1)
    freqs = jnp.exp(jnp.arange(half_dim, dtype=jnp.float32)
                    * (-math.log(10000.0) / denom))
    args = t[:, None] * freqs[None, :]
    pe = jnp.zeros((t.shape[0], hidden_dim), jnp.float32)
    pe = pe.at[:, 0::2].set(jnp.sin(args))
    pe = pe.at[:, 1::2].set(jnp.cos(args))

    h = jax.nn.relu(x @ params["w_proj"] + params["b_proj"])
    te = pe @ params["w_time"] + params["b_time"]
    h = h + te
    h = jax.nn.relu(h @ params["w_h"] + params["b_h"])
    return h @ params["w_out"] + params["b_out"]


if __name__ == "__main__":
    data_dim = 4
    hidden_dim = 32
    batch = 8

    key = jax.random.PRNGKey(0)
    kx, kt, kp = jax.random.split(key, 3)

    x = jax.random.normal(kx, (batch, data_dim), jnp.float32)
    t = jax.random.uniform(kt, (batch,), jnp.float32)
    params = init_params(kp, data_dim, hidden_dim)

    ref = reference_forward(x, t, params, hidden_dim)

    # f32 weights: exact parity with the reference.
    out = jax.block_until_ready(flow_matching_forward(x, t, params))
    assert out.shape == (batch, data_dim)
    assert jnp.allclose(out, ref, atol=1e-5, rtol=1e-5), "f32 mismatch vs reference"

    # bf16 weights: MXU-native path, looser tolerance.
    out_bf16 = jax.block_until_ready(
        flow_matching_forward(x, t, params, weight_dtype=jnp.bfloat16))
    assert jnp.allclose(out_bf16, ref, atol=5e-2, rtol=5e-2), "bf16 mismatch vs reference"

    print("KERNEL_OK")
</pallas_src>

<mosaic_0001>
module attributes {stable_mosaic.version = 11 : i64} {
  func.func @flow_matching_kernel(%arg0: i32, %arg1: memref<8x128xf32, #tpu.memory_space<vmem>>, %arg2: memref<1x128xf32, #tpu.memory_space<vmem>>, %arg3: memref<128x128xf32, #tpu.memory_space<vmem>>, %arg4: memref<1x128xf32, #tpu.memory_space<vmem>>, %arg5: memref<256x128xf32, #tpu.memory_space<vmem>>, %arg6: memref<128x128xf32, #tpu.memory_space<vmem>>, %arg7: memref<1x128xf32, #tpu.memory_space<vmem>>, %arg8: memref<128x128xf32, #tpu.memory_space<vmem>>, %arg9: memref<1x128xf32, #tpu.memory_space<vmem>>, %arg10: memref<8x128xf32, #tpu.memory_space<vmem>>) attributes {dimension_semantics = [#tpu.dimension_semantics<parallel>], iteration_bounds = array<i64: 1>, scalar_prefetch = 0 : i64, scratch_operands = 0 : i64, tpu.core_type = #tpu.core_type<tc>, window_params = [{transform_indices = @transform_0, window_bounds = array<i64: 8, 128>}, {pipeline_mode = #tpu.pipeline_mode<synchronous>, transform_indices = @transform_1, window_bounds = array<i64: 1, 128>}, {pipeline_mode = #tpu.pipeline_mode<synchronous>, transform_indices = @transform_2, window_bounds = array<i64: 128, 128>}, {pipeline_mode = #tpu.pipeline_mode<synchronous>, transform_indices = @transform_3, window_bounds = array<i64: 1, 128>}, {pipeline_mode = #tpu.pipeline_mode<synchronous>, transform_indices = @transform_4, window_bounds = array<i64: 256, 128>}, {pipeline_mode = #tpu.pipeline_mode<synchronous>, transform_indices = @transform_5, window_bounds = array<i64: 128, 128>}, {pipeline_mode = #tpu.pipeline_mode<synchronous>, transform_indices = @transform_6, window_bounds = array<i64: 1, 128>}, {pipeline_mode = #tpu.pipeline_mode<synchronous>, transform_indices = @transform_7, window_bounds = array<i64: 128, 128>}, {pipeline_mode = #tpu.pipeline_mode<synchronous>, transform_indices = @transform_8, window_bounds = array<i64: 1, 128>}, {transform_indices = @transform_9, window_bounds = array<i64: 8, 128>}]} {
    %c0 = arith.constant 0 : index
    %c0_0 = arith.constant 0 : index
    %0 = vector.load %arg1[%c0, %c0_0] : memref<8x128xf32, #tpu.memory_space<vmem>>, vector<8x128xf32>
    %c0_1 = arith.constant 0 : index
    %c0_2 = arith.constant 0 : index
    %1 = vector.load %arg3[%c0_1, %c0_2] : memref<128x128xf32, #tpu.memory_space<vmem>>, vector<128x128xf32>
    %cst = arith.constant dense<0.000000e+00> : vector<8x128xf32>
    %2 = tpu.matmul %0, %1, %cst {dimension_numbers = #tpu.dot_dimension_numbers<[1], [0], [0], [1], [0, 0, 1, 1], [], []>} : vector<8x128xf32>, vector<128x128xf32>, vector<8x128xf32> -> vector<8x128xf32>
    %c0_3 = arith.constant 0 : index
    %c0_4 = arith.constant 0 : index
    %3 = vector.load %arg4[%c0_3, %c0_4] : memref<1x128xf32, #tpu.memory_space<vmem>>, vector<1x128xf32>
    %4 = vector.broadcast %3 : vector<1x128xf32> to vector<8x128xf32>
    %5 = arith.addf %2, %4 : vector<8x128xf32>
    %cst_5 = arith.constant 0.000000e+00 : f32
    %6 = vector.broadcast %cst_5 : f32 to vector<8x128xf32>
    %7 = arith.maximumf %5, %6 : vector<8x128xf32>
    %8 = vector.extract_strided_slice %0 {offsets = [0, 0], sizes = [8, 1], strides = [1, 1]} : vector<8x128xf32> to vector<8x1xf32>
    %c0_6 = arith.constant 0 : index
    %c0_7 = arith.constant 0 : index
    %9 = vector.load %arg2[%c0_6, %c0_7] : memref<1x128xf32, #tpu.memory_space<vmem>>, vector<1x128xf32>
    %10 = vector.broadcast %8 : vector<8x1xf32> to vector<8x128xf32>
    %11 = vector.broadcast %9 : vector<1x128xf32> to vector<8x128xf32>
    %12 = arith.mulf %10, %11 : vector<8x128xf32>
    %13 = math.sin %12 : vector<8x128xf32>
    %14 = math.cos %12 : vector<8x128xf32>
    %15 = tpu.concatenate %13, %14 in 1 : vector<8x128xf32>, vector<8x128xf32> -> vector<8x256xf32>
    %c0_8 = arith.constant 0 : index
    %c0_9 = arith.constant 0 : index
    %16 = vector.load %arg5[%c0_8, %c0_9] : memref<256x128xf32, #tpu.memory_space<vmem>>, vector<256x128xf32>
    %cst_10 = arith.constant dense<0.000000e+00> : vector<8x128xf32>
    %17 = tpu.matmul %15, %16, %cst_10 {dimension_numbers = #tpu.dot_dimension_numbers<[1], [0], [0], [1], [0, 0, 1, 1], [], []>} : vector<8x256xf32>, vector<256x128xf32>, vector<8x128xf32> -> vector<8x128xf32>
    %18 = arith.addf %7, %17 : vector<8x128xf32>
    %c0_11 = arith.constant 0 : index
    %c0_12 = arith.constant 0 : index
    %19 = vector.load %arg6[%c0_11, %c0_12] : memref<128x128xf32, #tpu.memory_space<vmem>>, vector<128x128xf32>
    %cst_13 = arith.constant dense<0.000000e+00> : vector<8x128xf32>
    %20 = tpu.matmul %18, %19, %cst_13 {dimension_numbers = #tpu.dot_dimension_numbers<[1], [0], [0], [1], [0, 0, 1, 1], [], []>} : vector<8x128xf32>, vector<128x128xf32>, vector<8x128xf32> -> vector<8x128xf32>
    %c0_14 = arith.constant 0 : index
    %c0_15 = arith.constant 0 : index
    %21 = vector.load %arg7[%c0_14, %c0_15] : memref<1x128xf32, #tpu.memory_space<vmem>>, vector<1x128xf32>
    %22 = vector.broadcast %21 : vector<1x128xf32> to vector<8x128xf32>
    %23 = arith.addf %20, %22 : vector<8x128xf32>
    %cst_16 = arith.constant 0.000000e+00 : f32
    %24 = vector.broadcast %cst_16 : f32 to vector<8x128xf32>
    %25 = arith.maximumf %23, %24 : vector<8x128xf32>
    %c0_17 = arith.constant 0 : index
    %c0_18 = arith.constant 0 : index
    %26 = vector.load %arg8[%c0_17, %c0_18] : memref<128x128xf32, #tpu.memory_space<vmem>>, vector<128x128xf32>
    %cst_19 = arith.constant dense<0.000000e+00> : vector<8x128xf32>
    %27 = tpu.matmul %25, %26, %cst_19 {dimension_numbers = #tpu.dot_dimension_numbers<[1], [0], [0], [1], [0, 0, 1, 1], [], []>} : vector<8x128xf32>, vector<128x128xf32>, vector<8x128xf32> -> vector<8x128xf32>
    %c0_20 = arith.constant 0 : index
    %c0_21 = arith.constant 0 : index
    %28 = vector.load %arg9[%c0_20, %c0_21] : memref<1x128xf32, #tpu.memory_space<vmem>>, vector<1x128xf32>
    %29 = vector.broadcast %28 : vector<1x128xf32> to vector<8x128xf32>
    %30 = arith.addf %27, %29 : vector<8x128xf32>
    %c0_22 = arith.constant 0 : index
    %c0_23 = arith.constant 0 : index
    %31 = vector.load %arg10[%c0_22, %c0_23] : memref<8x128xf32, #tpu.memory_space<vmem>>, vector<8x128xf32>
    tpu.vector_store %arg10[%c0_22, %c0_23], %30 {strides = array<i32>} : memref<8x128xf32, #tpu.memory_space<vmem>>, vector<8x128xf32>,
    return
  }
  func.func @transform_0(%arg0: i32) -> (i32, i32) {
    %c0_i32 = arith.constant 0 : i32
    %c0_i32_0 = arith.constant 0 : i32
    return %arg0, %c0_i32 : i32, i32
  }
  func.func @transform_1(%arg0: i32) -> (i32, i32) {
    %c0_i32 = arith.constant 0 : i32
    %c0_i32_0 = arith.constant 0 : i32
    %c0_i32_1 = arith.constant 0 : i32
    return %c0_i32, %c0_i32_0 : i32, i32
  }
  func.func @transform_2(%arg0: i32) -> (i32, i32) {
    %c0_i32 = arith.constant 0 : i32
    %c0_i32_0 = arith.constant 0 : i32
    %c0_i32_1 = arith.constant 0 : i32
    return %c0_i32, %c0_i32_0 : i32, i32
  }
  func.func @transform_3(%arg0: i32) -> (i32, i32) {
    %c0_i32 = arith.constant 0 : i32
    %c0_i32_0 = arith.constant 0 : i32
    %c0_i32_1 = arith.constant 0 : i32
    return %c0_i32, %c0_i32_0 : i32, i32
  }
  func.func @transform_4(%arg0: i32) -> (i32, i32) {
    %c0_i32 = arith.constant 0 : i32
    %c0_i32_0 = arith.constant 0 : i32
    %c0_i32_1 = arith.constant 0 : i32
    return %c0_i32, %c0_i32_0 : i32, i32
  }
  func.func @transform_5(%arg0: i32) -> (i32, i32) {
    %c0_i32 = arith.constant 0 : i32
    %c0_i32_0 = arith.constant 0 : i32
    %c0_i32_1 = arith.constant 0 : i32
    return %c0_i32, %c0_i32_0 : i32, i32
  }
  func.func @transform_6(%arg0: i32) -> (i32, i32) {
    %c0_i32 = arith.constant 0 : i32
    %c0_i32_0 = arith.constant 0 : i32
    %c0_i32_1 = arith.constant 0 : i32
    return %c0_i32, %c0_i32_0 : i32, i32
  }
  func.func @transform_7(%arg0: i32) -> (i32, i32) {
    %c0_i32 = arith.constant 0 : i32
    %c0_i32_0 = arith.constant 0 : i32
    %c0_i32_1 = arith.constant 0 : i32
    return %c0_i32, %c0_i32_0 : i32, i32
  }
  func.func @transform_8(%arg0: i32) -> (i32, i32) {
    %c0_i32 = arith.constant 0 : i32
    %c0_i32_0 = arith.constant 0 : i32
    %c0_i32_1 = arith.constant 0 : i32
    return %c0_i32, %c0_i32_0 : i32, i32
  }
  func.func @transform_9(%arg0: i32) -> (i32, i32) {
    %c0_i32 = arith.constant 0 : i32
    %c0_i32_0 = arith.constant 0 : i32
    return %arg0, %c0_i32 : i32, i32
  }
}

</mosaic_0001>

<bundles_post_ra>
// kernel: tpu_custom_call.1
= control target key start
LH: loop header
LB: loop body
LE: loop exit
PB: predicated region body
PF: predicated region fallthrough
CT: control target
= control target key end

     0   :  { %14 = vsyncpa [#allocation3], 0  ;;  %s1415_s0 = inlined_call_operand.hbm [shape: f32[8,128], index: 0, kind: input, shape index: {}]   ;;  %s1416_s1 = inlined_call_operand.vmem [shape: f32[1,128], index: 1, kind: input, shape index: {}]   ;;  %s1417_s2 = inlined_call_operand.hbm [shape: f32[128,128], index: 2, kind: input, shape index: {}]   ;;  %s1418_s3 = inlined_call_operand.vmem [shape: f32[1,128], index: 3, kind: input, shape index: {}]   ;;  %s1419_s4 = inlined_call_operand.hbm [shape: f32[256,128], index: 4, kind: input, shape index: {}]   ;;  %s1420_s5 = inlined_call_operand.hbm [shape: f32[128,128], index: 5, kind: input, shape index: {}]   ;;  %s1421_s6 = inlined_call_operand.vmem [shape: f32[1,128], index: 6, kind: input, shape index: {}]   ;;  %s1422_s7 = inlined_call_operand.hbm [shape: f32[128,128], index: 7, kind: input, shape index: {}]   ;;  %s1423_s8 = inlined_call_operand.vmem [shape: f32[1,128], index: 8, kind: input, shape index: {}]   ;;  %s1424_s9 = inlined_call_operand.hbm [shape: f32[8,128], index: 9, kind: output, shape index: {}]  }
   0x1   :  { %15 = vsyncpa [#allocation6], 0 }
   0x2   :  { %16 = vsyncpa [#allocation9], 0 }
   0x3   :  { %17 = vsyncpa [#allocation4], 0  ;;  %s1196_s30 = smov [#allocation5]   ;;  %s1056_s13 = scalar_lea.hbm %s1417_s2, 2048 }
   0x4   :  { %s35_s10 = sshll.u32 %s1196_s30, 4  ;;  %p1057_p0 = scmp.ne.s32.totalorder %s1417_s2, %s1056_s13  ;;  %s36_s10 = int_to_ptr.vmem [resolvable:$true] %s35_s10 }
   0x5   :  { %p1060_p1 = scmp.lt.u32.totalorder %s1056_s13, %s1417_s2 }
   0x7   :  { %p1062_p2 = pnand %p1060_p1, %p1057_p0 }
   0x9   :  { %1065 = shalt.err (!%p1062_p2)
}
   0xa   :  { %s1066_s18 = scalar_lea.vmem %s36_s10, 2048  ;;  %p1071_p4 = scmp.lt.s32.totalorder %s36_s10, %s36_s10 }
   0xb   :  { %p1067_p3 = scmp.ne.s32.totalorder %s36_s10, %s1066_s18  ;;  %p1072_p5 = scmp.lt.s32.totalorder %s1066_s18, %s1066_s18 }
   0xd   :  { %p1073_p6 = por %p1072_p5, %p1071_p4 }
   0xf   :  { %p1074_p7 = pnand %p1073_p6, %p1067_p3 }
  0x11   :  { %1077 = shalt.err (!%p1074_p7)
}
  0x12   :  { %s1197_s19 = smov 128   ;;  %s1198_s20 = smov 8  }
  0x13   :  { %41 = dma.hbm_to_vmem [thread:$0]  %s1417_s2, 2048, %s36_s10, [#allocation6], %s1197_s19, %s1197_s19, %s1198_s20  }
  0x14   :  { %s1199_s23 = smov [#allocation8]   ;;  %s1200_s25 = smov [#allocation2]  }
  0x15   :  { %s61_s24 = sshll.u32 %s1199_s23, 4  ;;  %s24_s26 = sshll.u32 %s1200_s25, 4  ;;  %s62_s24 = int_to_ptr.vmem [resolvable:$true] %s61_s24  ;;  %s25_s26 = int_to_ptr.vmem [resolvable:$true] %s24_s26 }
  0x16   :  { %s1078_s29 = scalar_lea.hbm %s1420_s5, 2048 }
  0x17   :  { %p1079_p8 = scmp.ne.s32.totalorder %s1420_s5, %s1078_s29  ;;  %p1082_p9 = scmp.lt.u32.totalorder %s1078_s29, %s1420_s5 }
  0x19   :  { %p1084_p10 = pnand %p1082_p9, %p1079_p8 }
  0x1b   :  { %1087 = shalt.err (!%p1084_p10)
}
  0x1c   :  { %s1088_s2 = scalar_lea.vmem %s62_s24, 2048  ;;  %p1093_p12 = scmp.lt.s32.totalorder %s62_s24, %s62_s24 }
  0x1d   :  { %p1089_p11 = scmp.ne.s32.totalorder %s62_s24, %s1088_s2  ;;  %p1094_p13 = scmp.lt.s32.totalorder %s1088_s2, %s1088_s2 }
  0x1f   :  { %p1095_p0 = por %p1094_p13, %p1093_p12 }
  0x21   :  { %p1096_p1 = pnand %p1095_p0, %p1089_p11 }
  0x23   :  { %1099 = shalt.err (!%p1096_p1)
}
  0x24   :  { %67 = dma.hbm_to_vmem [thread:$0]  %s1420_s5, 2048, %s62_s24, [#allocation9], %s1197_s19, %s1197_s19, %s1198_s20  }
  0x25   :  { %s1100_s17 = scalar_lea.hbm %s1415_s0, 128 }
  0x26   :  { %p1101_p2 = scmp.ne.s32.totalorder %s1415_s0, %s1100_s17  ;;  %p1104_p3 = scmp.lt.u32.totalorder %s1100_s17, %s1415_s0 }
  0x28   :  { %p1106_p4 = pnand %p1104_p3, %p1101_p2 }
  0x2a   :  { %1109 = shalt.err (!%p1106_p4)
}
  0x2b   :  { %s1110_s25 = scalar_lea.vmem %s25_s26, 128  ;;  %p1115_p6 = scmp.lt.s32.totalorder %s25_s26, %s25_s26 }
  0x2c   :  { %p1111_p5 = scmp.ne.s32.totalorder %s25_s26, %s1110_s25  ;;  %p1116_p7 = scmp.lt.s32.totalorder %s1110_s25, %s1110_s25 }
  0x2e   :  { %p1117_p8 = por %p1116_p7, %p1115_p6 }
  0x30   :  { %p1118_p9 = pnand %p1117_p8, %p1111_p5 }
  0x32   :  { %1121 = shalt.err (!%p1118_p9)
}
  0x33   :  { %27 = dma.hbm_to_vmem [thread:$0]  %s1415_s0, 128, %s25_s26, [#allocation3]  }
  0x34   :  { %s1201_s27 = smov [#allocation7]   ;;  %s1202_s29 = smov [#allocation10]  }
  0x35   :  { %s49_s28 = sshll.u32 %s1201_s27, 4  ;;  %s75_s30 = sshll.u32 %s1202_s29, 4  ;;  %s50_s28 = int_to_ptr.vmem [resolvable:$true] %s49_s28  ;;  %s76_s30 = int_to_ptr.vmem [resolvable:$true] %s75_s30 }
  0x36   :  { %s1122_s13 = scalar_lea.hbm %s1419_s4, 4096 }
  0x37   :  { %p1123_p10 = scmp.ne.s32.totalorder %s1419_s4, %s1122_s13  ;;  %p1126_p11 = scmp.lt.u32.totalorder %s1122_s13, %s1419_s4 }
  0x39   :  { %p1128_p12 = pnand %p1126_p11, %p1123_p10 }
  0x3b   :  { %1131 = shalt.err (!%p1128_p12)
}
  0x3c   :  { %s1132_s0 = scalar_lea.vmem %s50_s28, 4096  ;;  %p1137_p0 = scmp.lt.s32.totalorder %s50_s28, %s50_s28 }
  0x3d   :  { %p1133_p13 = scmp.ne.s32.totalorder %s50_s28, %s1132_s0  ;;  %p1138_p1 = scmp.lt.s32.totalorder %s1132_s0, %s1132_s0 }
  0x3f   :  { %p1139_p2 = por %p1138_p1, %p1137_p0 }
  0x41   :  { %p1140_p3 = pnand %p1139_p2, %p1133_p13 }
  0x43   :  { %1143 = shalt.err (!%p1140_p3)
}
  0x44   :  { %55 = dma.hbm_to_vmem [thread:$0]  %s1419_s4, 4096, %s50_s28, [#allocation6], %s1197_s19, %s1197_s19, %s1198_s20  }
  0x45   :  { %s1144_s21 = scalar_lea.hbm %s1422_s7, 2048 }
  0x46   :  { %p1145_p4 = scmp.ne.s32.totalorder %s1422_s7, %s1144_s21  ;;  %p1148_p5 = scmp.lt.u32.totalorder %s1144_s21, %s1422_s7 }
  0x48   :  { %p1150_p6 = pnand %p1148_p5, %p1145_p4 }
  0x4a   :  { %1153 = shalt.err (!%p1150_p6)
}
  0x4b   :  { %s1154_s24 = scalar_lea.vmem %s76_s30, 2048  ;;  %p1159_p8 = scmp.lt.s32.totalorder %s76_s30, %s76_s30 }
  0x4c   :  { %p1155_p7 = scmp.ne.s32.totalorder %s76_s30, %s1154_s24  ;;  %p1160_p9 = scmp.lt.s32.totalorder %s1154_s24, %s1154_s24 }
  0x4e   :  { %p1161_p10 = por %p1160_p9, %p1159_p8 }
  0x50   :  { %p1162_p11 = pnand %p1161_p10, %p1155_p7 }
  0x52   :  { %1165 = shalt.err (!%p1162_p11)
}
  0x53   :  { %81 = dma.hbm_to_vmem [thread:$0]  %s1422_s7, 2048, %s76_s30, [#allocation9], %s1197_s19, %s1197_s19, %s1198_s20  }
  0x54   :  { %1188 = dma.done.wait [#allocation3], 128  }
  0x55   :  { %1189 = vsyncadd [#allocation3], 4294967168 }
  0x56   :  { %1190 = dma.done.wait [#allocation6], 6144  }
  0x57   :  { %1191 = vsyncadd [#allocation6], 4294961152 }
  0x58   :  { %1192 = dma.done.wait [#allocation9], 4096  }
  0x59   :  { %1193 = vsyncadd [#allocation9], 4294963200  ;;  %v1203_v0 = vmov 0   ;;  %v1336_v1 = vld [vmem:[#allocation2] sm:$0xff]  ;;  %v100_v2 = vld [vmem:[#allocation5] sm:$0xff]  ;;  %v1204_v5 = vmov 0.0|0.0  }
  0x5a   :  { %1051 = vset.pattern.permute.xlu0 %v1203_v0  ;;  %v101_v3 = vld [vmem:[#allocation5 + $0x8] sm:$0xff]  ;;  %v430_v4 = vld [vmem:[#allocation7 + $0x80] sm:$0xff]  ;;  %925 = vmatprep.subr.bf16.mxu0 %v1204_v5  ;;  %vm1205_vm0 = vmmov 0   ;;  %v1206_v10 = vmov 0.0   ;;  %v102_v13 = vld [vmem:[#allocation5 + $0x10] sm:$0xff]  ;;  %s1213_s11 = smov [#allocation11]  }
  0x5b   :  { %197 = vperm.xlu0 %1051, %v1336_v1   ;;  %v926_v6 = vpack.c.bf16 %v101_v3, %v100_v2  ;;  %v431_v7 = vld [vmem:[#allocation7 + $0x88] sm:$0xff]  ;;  %v414_v8 = vld [vmem:[#allocation7] sm:$0xff]  ;;  %852 = vmatprep.mubr.msk.f32.mxu0 %vm1205_vm0, %v1206_v10  ;;  %v103_v14 = vld [vmem:[#allocation5 + $0x18] sm:$0xff]  ;;  %s711_s12 = sshll.u32 %s1213_s11, 4  ;;  %s712_s12 = int_to_ptr.vmem [resolvable:$true] %s711_s12 }
  0x5c   :  { %v415_v9 = vld [vmem:[#allocation7 + $0x8] sm:$0xff]  ;;  %v949_v11 = vpack.c.bf16 %v431_v7, %v430_v4  ;;  %v432_v15 = vld [vmem:[#allocation7 + $0x90] sm:$0xff]  ;;  %v929_v16 = vpack.c.bf16 %v103_v14, %v102_v13  ;;  %v433_v17 = vld [vmem:[#allocation7 + $0x98] sm:$0xff]  ;;  %s1166_s13 = scalar_lea.vmem %s712_s12, 128  ;;  %p1171_p13 = scmp.lt.s32.totalorder %s712_s12, %s712_s12 }
  0x5d   :  { %v951_v12 = vpack.c.bf16 %v415_v9, %v414_v8  ;;  %927 = vmatpush3.bf16.msra.mxu0 %v926_v6  ;;  %v416_v18 = vld [vmem:[#allocation7 + $0x10] sm:$0xff]  ;;  %v417_v19 = vld [vmem:[#allocation7 + $0x18] sm:$0xff]  ;;  %v953_v20 = vpack.c.bf16 %v433_v17, %v432_v15  ;;  %v104_v21 = vld [vmem:[#allocation5 + $0x20] sm:$0xff]  ;;  %p1167_p12 = scmp.ne.s32.totalorder %s712_s12, %s1166_s13  ;;  %p1172_p0 = scmp.lt.s32.totalorder %s1166_s13, %s1166_s13 }
  0x5e   :  { %950 = vmatprep.subr.bf16.mxu1 %v949_v11  ;;  %928 = vmatprep.subr.bf16.mxu0 %v1204_v5  ;;  %v105_v22 = vld [vmem:[#allocation5 + $0x28] sm:$0xff]  ;;  %v434_v23 = vld [vmem:[#allocation7 + $0xa0] sm:$0xff]  ;;  %v955_v24 = vpack.c.bf16 %v417_v19, %v416_v18  ;;  %v436_v30 = vld [vmem:[#allocation7 + $0xb0] sm:$0xff] }
  0x5f   :  { %952 = vmatpush3.bf16.msra.mxu1 %v951_v12  ;;  %v435_v25 = vld [vmem:[#allocation7 + $0xa8] sm:$0xff]  ;;  %v418_v27 = vld [vmem:[#allocation7 + $0x20] sm:$0xff]  ;;  %v932_v29 = vpack.c.bf16 %v105_v22, %v104_v21  ;;  %v437_v31 = vld [vmem:[#allocation7 + $0xb8] sm:$0xff]  ;;  %p1173_p1 = por %p1172_p0, %p1171_p13 }
  0x60   :  { %954 = vmatprep.subr.bf16.mxu1 %v953_v20  ;;  %v957_v26 = vpack.c.bf16 %v435_v25, %v434_v23  ;;  %v419_v28 = vld [vmem:[#allocation7 + $0x28] sm:$0xff]  ;;  %v106_v32 = vld [vmem:[#allocation5 + $0x30] sm:$0xff]  ;;  %v107_v33 = vld [vmem:[#allocation5 + $0x38] sm:$0xff]  ;;  %v961_v35 = vpack.c.bf16 %v437_v31, %v436_v30 }
  0x61   :  { %930 = vmatpush3.bf16.msra.mxu0 %v929_v16  ;;  %v959_v34 = vpack.c.bf16 %v419_v28, %v418_v27  ;;  %v420_v36 = vld [vmem:[#allocation7 + $0x30] sm:$0xff]  ;;  %v421_v37 = vld [vmem:[#allocation7 + $0x38] sm:$0xff]  ;;  %v935_v38 = vpack.c.bf16 %v107_v33, %v106_v32  ;;  %v438_v39 = vld [vmem:[#allocation7 + $0xc0] sm:$0xff]  ;;  %p1174_p2 = pnand %p1173_p1, %p1167_p12 }
  0x62   :  { %931 = vmatprep.subr.bf16.mxu0 %v1204_v5  ;;  %v439_v40 = vld [vmem:[#allocation7 + $0xc8] sm:$0xff]  ;;  %v108_v41 = vld [vmem:[#allocation5 + $0x40] sm:$0xff]  ;;  %v963_v43 = vpack.c.bf16 %v421_v37, %v420_v36  ;;  %v440_v48 = vld [vmem:[#allocation7 + $0xd0] sm:$0xff] }
  0x63   :  { %956 = vmatpush3.bf16.msra.mxu1 %v955_v24  ;;  %v109_v42 = vld [vmem:[#allocation5 + $0x48] sm:$0xff]  ;;  %v965_v44 = vpack.c.bf16 %v439_v40, %v438_v39  ;;  %v422_v45 = vld [vmem:[#allocation7 + $0x40] sm:$0xff]  ;;  %v441_v49 = vld [vmem:[#allocation7 + $0xd8] sm:$0xff] }
  0x64   :  { %958 = vmatprep.subr.bf16.mxu1 %v957_v26  ;;  %v423_v46 = vld [vmem:[#allocation7 + $0x48] sm:$0xff]  ;;  %v938_v47 = vpack.c.bf16 %v109_v42, %v108_v41  ;;  %v110_v50 = vld [vmem:[#allocation5 + $0x50] sm:$0xff]  ;;  %v111_v51 = vld [vmem:[#allocation5 + $0x58] sm:$0xff]  ;;  %v969_v53 = vpack.c.bf16 %v441_v49, %v440_v48  ;;  %v1207_v49 = vmov 2102212464  }
  0x65   :  { %933 = vmatpush3.bf16.msra.mxu0 %v932_v29  ;;  %v967_v52 = vpack.c.bf16 %v423_v46, %v422_v45  ;;  %v424_v54 = vld [vmem:[#allocation7 + $0x50] sm:$0xff]  ;;  %v425_v55 = vld [vmem:[#allocation7 + $0x58] sm:$0xff]  ;;  %v941_v56 = vpack.c.bf16 %v111_v51, %v110_v50  ;;  %v442_v57 = vld [vmem:[#allocation7 + $0xe0] sm:$0xff]  ;;  %v1208_v51 = vmov 920167782  }
  0x66   :  { %934 = vmatprep.subr.bf16.mxu0 %v1204_v5  ;;  %v443_v58 = vld [vmem:[#allocation7 + $0xe8] sm:$0xff]  ;;  %v112_v59 = vld [vmem:[#allocation5 + $0x60] sm:$0xff]  ;;  %v971_v61 = vpack.c.bf16 %v425_v55, %v424_v54  ;;  %v444_v3 = vld [vmem:[#allocation7 + $0xf0] sm:$0xff]  ;;  %v1209_v55 = vmov 1326507024  }
  0x67   :  { %960 = vmatpush3.bf16.msra.mxu1 %v959_v34  ;;  %v113_v60 = vld [vmem:[#allocation5 + $0x68] sm:$0xff]  ;;  %v973_v62 = vpack.c.bf16 %v443_v58, %v442_v57  ;;  %v426_v63 = vld [vmem:[#allocation7 + $0x60] sm:$0xff]  ;;  %v445_v4 = vld [vmem:[#allocation7 + $0xf8] sm:$0xff]  ;;  %v1210_v57 = vmov 683565275  }
  0x68   :  { %962 = vmatprep.subr.bf16.mxu1 %v961_v35  ;;  %v427_v0 = vld [vmem:[#allocation7 + $0x68] sm:$0xff]  ;;  %v944_v2 = vpack.c.bf16 %v113_v60, %v112_v59  ;;  %v114_v6 = vld [vmem:[#allocation5 + $0x70] sm:$0xff]  ;;  %v115_v7 = vld [vmem:[#allocation5 + $0x78] sm:$0xff]  ;;  %v977_v9 = vpack.c.bf16 %v445_v4, %v444_v3  ;;  %v1211_v59 = vmov 2475754826  }
  0x69   :  { %936 = vmatpush3.bf16.msra.mxu0 %v935_v38  ;;  %v975_v8 = vpack.c.bf16 %v427_v0, %v426_v63  ;;  %v428_v11 = vld [vmem:[#allocation7 + $0x70] sm:$0xff]  ;;  %v429_v12 = vld [vmem:[#allocation7 + $0x78] sm:$0xff]  ;;  %v947_v13 = vpack.c.bf16 %v115_v7, %v114_v6  ;;  %v517_v15 = vld [vmem:[#allocation8] sm:$0xff] }
  0x6a   :  { %937 = vmatprep.subr.bf16.mxu0 %v1204_v5  ;;  %v979_v14 = vpack.c.bf16 %v429_v12, %v428_v11  ;;  %v518_v16 = vld [vmem:[#allocation8 + $0x8] sm:$0xff]  ;;  %v519_v17 = vld [vmem:[#allocation8 + $0x10] sm:$0xff]  ;;  %v520_v19 = vld [vmem:[#allocation8 + $0x18] sm:$0xff] }
  0x6b   :  { %964 = vmatpush3.bf16.msra.mxu1 %v963_v43  ;;  %v982_v18 = vpack.c.bf16 %v518_v16, %v517_v15  ;;  %v985_v20 = vpack.c.bf16 %v520_v19, %v519_v17  ;;  %v521_v21 = vld [vmem:[#allocation8 + $0x20] sm:$0xff]  ;;  %v522_v22 = vld [vmem:[#allocation8 + $0x28] sm:$0xff]  ;;  %v524_v24 = vld [vmem:[#allocation8 + $0x38] sm:$0xff] }
  0x6c   :  { %966 = vmatprep.subr.bf16.mxu1 %v965_v44  ;;  %v988_v23 = vpack.c.bf16 %v522_v22, %v521_v21  ;;  %v525_v26 = vld [vmem:[#allocation8 + $0x40] sm:$0xff]  ;;  %v526_v27 = vld [vmem:[#allocation8 + $0x48] sm:$0xff]  ;;  %v527_v29 = vld [vmem:[#allocation8 + $0x50] sm:$0xff] }
  0x6d   :  { %939 = vmatpush3.bf16.msra.mxu0 %v938_v47  ;;  %v994_v28 = vpack.c.bf16 %v526_v27, %v525_v26  ;;  %v528_v30 = vld [vmem:[#allocation8 + $0x58] sm:$0xff]  ;;  %v529_v44 = vld [vmem:[#allocation8 + $0x60] sm:$0xff]  ;;  %v530_v45 = vld [vmem:[#allocation8 + $0x68] sm:$0xff] }
  0x6e   :  { %940 = vmatprep.subr.bf16.mxu0 %v1204_v5  ;;  %v997_v31 = vpack.c.bf16 %v528_v30, %v527_v29  ;;  %v723_v32 = vld [vmem:[%s1416_s1] ss:$0 sm:$0xff]  ;;  %v1000_v46 = vpack.c.bf16 %v530_v45, %v529_v44 }
  0x6f   :  { %968 = vmatpush3.bf16.msra.mxu1 %v967_v52 }
  0x70   :  { %970 = vmatprep.subr.bf16.mxu1 %v969_v53 }
  0x71   :  { %942 = vmatpush3.bf16.msra.mxu0 %v941_v56 }
  0x72   :  { %943 = vmatprep.subr.bf16.mxu0 %v1204_v5 }
  0x73   :  { %972 = vmatpush3.bf16.msra.mxu1 %v971_v61 }
  0x74   :  { %974 = vmatprep.subr.bf16.mxu1 %v973_v62  ;;  %v1212_v62 = vmov 2131351028  }
  0x75   :  { %945 = vmatpush3.bf16.msra.mxu0 %v944_v2 }
  0x76   :  { %946 = vmatprep.subr.bf16.mxu0 %v1204_v5 }
  0x77   :  { %976 = vmatpush3.bf16.msra.mxu1 %v975_v8 }
  0x78   :  { %978 = vmatprep.subr.bf16.mxu1 %v977_v9 }
  0x79   :  { %948 = vmatpush3.bf16.msra.mxu0 %v947_v13 }
  0x7a   :  { %981 = vmatprep.subr.bf16.mxu0 %v1204_v5 }
  0x7b   :  { %980 = vmatpush3.bf16.msra.mxu1 %v979_v14 }
  0x7c   :  { %853 = vmatmul.mubr.f32.vlgmr.msra.gmra.mrb[0].mxu0 %v1336_v1  ;;  %1005 = vmatprep.subr.bf16.mxu1 %v1204_v5  ;;  %v523_v1 = vld [vmem:[#allocation8 + $0x30] sm:$0xff] }
  0x7d   :  { %887 = vmatprep.mubr.msk.f32.mxu0 %vm1205_vm0, %v1206_v10  ;;  %983 = vmatpush3.bf16.msra.mxu0 %v982_v18  ;;  %v991_v25 = vpack.c.bf16 %v524_v24, %v523_v1 }
  0x7e   :  { %984 = vmatprep.subr.bf16.mxu0 %v1204_v5 }
  0x81   :  { %986 = vmatpush3.bf16.msra.mxu0 %v985_v20 }
  0x82   :  { %987 = vmatprep.subr.bf16.mxu0 %v1204_v5 }
  0x85   :  { %989 = vmatpush3.bf16.msra.mxu0 %v988_v23 }
  0x86   :  { %990 = vmatprep.subr.bf16.mxu0 %v1204_v5 }
  0x89   :  { %992 = vmatpush3.bf16.msra.mxu0 %v991_v25 }
  0x8a   :  { %993 = vmatprep.subr.bf16.mxu0 %v1204_v5 }
  0x8d   :  { %995 = vmatpush3.bf16.msra.mxu0 %v994_v28 }
  0x8e   :  { %996 = vmatprep.subr.bf16.mxu0 %v1204_v5 }
  0x91   :  { %998 = vmatpush3.bf16.msra.mxu0 %v997_v31 }
  0x92   :  { %999 = vmatprep.subr.bf16.mxu0 %v1204_v5 }
  0x95   :  { %1001 = vmatpush3.bf16.msra.mxu0 %v1000_v46 }
  0x96   :  { %1002 = vmatprep.subr.bf16.mxu0 %v1204_v5 }
  0xda   :  { %v198_v33 = vpop.permute.xlu0 %197 }
  0xdb   :  { %v1363_v34 = vmul.f32 %v723_v32, %v198_v33 }
  0xdd   :  { %v210_v35 = vand.u32 2139095040, %v1363_v34  ;;  %v207_v36 = vand.u32 2147483647, %v1363_v34  ;;  %vm209_vm8 = vcmp.lt.s32.totalorder %v1363_v34, 0 }
  0xdf   :  { %v211_v37 = vshrl.u32 %v210_v35, 23  ;;  %v214_v39 = vand.u32 8388607, %v207_v36  ;;  %vm208_vm9 = vcmp.le.f32.partialorder %v207_v36, 0.7853982 }
  0xe1   :  { %v724_v38 = vadd.s32 4294967169, %v211_v37  ;;  %v215_v42 = vor.u32 8388608, %v214_v39 }
  0xe3   :  { %v217_v40 = vadd.s32 1, %v724_v38  ;;  %v255_v53 = vshll.u32 %v215_v42, 8 }
  0xe5   :  { %vm218_vm1 = vcmp.gt.s32.totalorder %v217_v40, 0 }
  0xe6   :  { %v219_v41 = vsel %vm218_vm1, %v217_v40, 0  ;;  %vm299_vm1 = vweird.f32 %v1363_v34 }
  0xe7   :  { %v221_v43 = vand.u32 31, %v219_v41  ;;  %v220_v47 = vshrl.u32 %v219_v41, 5 }
  0xe9   :  { %v222_v48 = vsub.s32 32, %v221_v43  ;;  %v233_v50 = vshll.u32 %v1207_v49, %v221_v43  ;;  %v236_v52 = vshll.u32 %v1208_v51, %v221_v43  ;;  %v224_v58 = vshll.u32 %v1210_v57, %v221_v43 }
  0xea   :  { %v227_v61 = vshll.u32 %v1211_v59, %v221_v43  ;;  %v230_v0 = vshll.u32 %v1212_v62, %v221_v43  ;;  %vm242_vm2 = vcmp.lt.s32.totalorder %v220_v47, 4  ;;  %vm239_vm3 = vcmp.lt.s32.totalorder %v220_v47, 1 }
  0xeb   :  { %v234_v54 = vshrl.u32 %v1208_v51, %v222_v48  ;;  %v237_v56 = vshrl.u32 %v1209_v55, %v222_v48  ;;  %v225_v60 = vshrl.u32 %v1211_v59, %v222_v48  ;;  %v228_v63 = vshrl.u32 %v1212_v62, %v222_v48 }
  0xec   :  { %v231_v2 = vshrl.u32 %v1207_v49, %v222_v48  ;;  %v223_v7 = vshrl.u32 %v1210_v57, %v222_v48  ;;  %vm240_vm4 = vcmp.lt.s32.totalorder %v220_v47, 2  ;;  %vm241_vm5 = vcmp.lt.s32.totalorder %v220_v47, 3 }
  0xed   :  { %v235_v3 = vor.u32 %v234_v54, %v233_v50  ;;  %v238_v4 = vor.u32 %v237_v56, %v236_v52  ;;  %v226_v6 = vor.u32 %v225_v60, %v224_v58  ;;  %v229_v8 = vor.u32 %v228_v63, %v227_v61 }
  0xee   :  { %v232_v9 = vor.u32 %v231_v2, %v230_v0 }
  0xef   :  { %v248_v11 = vsel %vm242_vm2, %v235_v3, 920167782  ;;  %v252_v12 = vsel %vm242_vm2, %v238_v4, 1326507024  ;;  %v247_v14 = vsel %vm239_vm3, %v226_v6, %v229_v8  ;;  %v243_v17 = vsel %vm239_vm3, %v223_v7, %v226_v6 }
  0xf0   :  { %v244_v13 = vsel %vm242_vm2, %v232_v9, 2102212464  ;;  %v249_v15 = vsel %vm241_vm5, %v232_v9, %v248_v11  ;;  %v251_v16 = vsel %vm239_vm3, %v229_v8, %v232_v9  ;;  %v253_v20 = vsel %vm241_vm5, %v235_v3, %v252_v12 }
  0xf1   :  { %v245_v18 = vsel %vm241_vm5, %v229_v8, %v244_v13  ;;  %v250_v19 = vsel %vm240_vm4, %v247_v14, %v249_v15  ;;  %v254_v21 = vsel %vm240_vm4, %v251_v16, %v253_v20  ;;  %v531_v14 = vld [vmem:[#allocation8 + $0x70] sm:$0xff]  ;;  %v532_v15 = vld [vmem:[#allocation8 + $0x78] sm:$0xff] }
  0xf2   :  { %v1370_v22 = vmul.u32.u64.low %v255_v53, %v250_v19  ;;  %v1371_v23 = vmul.u32.u64.high %v255_v53, %v250_v19, %v1370_v22  ;;  %v1373_v1 = vmul.u32.u64.low %v255_v53, %v254_v21  ;;  %v1374_v24 = vmul.u32.u64.high %v255_v53, %v254_v21, %v1373_v1  ;;  %v613_v19 = vld [vmem:[#allocation10 + $0x10] sm:$0xff] }
  0xf3   :  { %v246_v25 = vsel %vm240_vm4, %v243_v17, %v245_v18  ;;  %v1003_v16 = vpack.c.bf16 %v532_v15, %v531_v14  ;;  %v611_v17 = vld [vmem:[#allocation10] sm:$0xff]  ;;  %v612_v18 = vld [vmem:[#allocation10 + $0x8] sm:$0xff] }
  0xf4   :  { %v265_v26 = vadd.s32 1, %v1371_v23  ;;  %v262_v27 = vmul.u32 %v255_v53, %v246_v25  ;;  %vm264_vm6 = vc.u32 %v1374_v24, %v1370_v22  ;;  %v263_v41 = vadd.s32 %v1370_v22, %v1374_v24  ;;  %v615_v22 = vld [vmem:[#allocation10 + $0x20] sm:$0xff]  ;;  %v618_v24 = vld [vmem:[#allocation10 + $0x38] sm:$0xff] }
  0xf5   :  { %1004 = vmatpush3.bf16.msra.mxu0 %v1003_v16  ;;  %v1006_v20 = vpack.c.bf16 %v612_v18, %v611_v17 }
  0xf6   :  { %v266_v28 = vsel %vm264_vm6, %v265_v26, %v1371_v23  ;;  %v616_v23 = vld [vmem:[#allocation10 + $0x28] sm:$0xff]  ;;  %v619_v26 = vld [vmem:[#allocation10 + $0x40] sm:$0xff] }
  0xf7   :  { %v267_v29 = vadd.s32 %v266_v28, %v262_v27  ;;  %v1012_v1 = vpack.c.bf16 %v616_v23, %v615_v22  ;;  %v620_v27 = vld [vmem:[#allocation10 + $0x48] sm:$0xff] }
  0xf8   :  { %v1018_v28 = vpack.c.bf16 %v620_v27, %v619_v26 }
  0xf9   :  { %v268_v30 = vadd.s32 536870912, %v267_v29 }
  0xfb   :  { %v269_v31 = vshrl.u32 %v268_v30, 30  ;;  %v622_v30 = vld [vmem:[#allocation10 + $0x58] sm:$0xff] }
  0xfd   :  { %v270_v32 = vshll.u32 %v269_v31, 30  ;;  %v293_v53 = vsub.s32 4, %v269_v31 }
  0xff   :  { %v271_v33 = vsub.s32 %v267_v29, %v270_v32  ;;  %v294_v56 = vsel %vm209_vm8, %v293_v53, %v269_v31  ;;  %v621_v29 = vld [vmem:[#allocation10 + $0x50] sm:$0xff]  ;;  %v623_v32 = vld [vmem:[#allocation10 + $0x60] sm:$0xff] }
 0x100   :  { %v296_v58 = vsel %vm208_vm9, 0, %v294_v56  ;;  %v1021_v31 = vpack.c.bf16 %v622_v30, %v621_v29 }
 0x101   :  { %v273_v35 = vsub.s32 0, %v271_v33  ;;  %v300_v59 = vadd.s32 3, %v296_v58  ;;  %v404_v60 = vand.u32 3, %v296_v58 }
 0x103   :  { %v725_v37 = vmin.u32 %v273_v35, %v271_v33  ;;  %v301_v61 = vand.u32 3, %v300_v59  ;;  %vm409_vm10 = vcmp.eq.s32.totalorder %v404_v60, 2  ;;  %vm406_vm12 = vcmp.eq.s32.totalorder %v404_v60, 0 }
 0x104   :  { %vm405_vm14 = vcmp.lt.s32.totalorder %v404_v60, 2 }
 0x105   :  { %v275_v38 = vclz %v725_v37  ;;  %vm306_vm11 = vcmp.eq.s32.totalorder %v301_v61, 2  ;;  %vm303_vm13 = vcmp.eq.s32.totalorder %v301_v61, 0  ;;  %vm302_vm15 = vcmp.lt.s32.totalorder %v301_v61, 2  ;;  %v722_v37 = vld [vmem:[%s1418_s3] ss:$0 sm:$0xff] }
 0x107   :  { %v726_v39 = vadd.s32 4294967294, %v275_v38 }
 0x109   :  { %vm727_vm7 = vcmp.lt.s32.totalorder %v726_v39, 0 }
 0x10a   :  { %v278_v40 = vsel %vm727_vm7, 0, %v726_v39 }
 0x10b   :  { %v279_v42 = vsub.s32 32, %v278_v40  ;;  %v283_v43 = vsub.s32 4294967266, %v278_v40  ;;  %v280_v44 = vshll.u32 %v271_v33, %v278_v40  ;;  %v624_v33 = vld [vmem:[#allocation10 + $0x68] sm:$0xff] }
 0x10c   :  { %v1024_v35 = vpack.c.bf16 %v624_v33, %v623_v32 }
 0x10d   :  { %v281_v45 = vshrl.u32 %v263_v41, %v279_v42  ;;  %v284_v46 = vadd.s32 127, %v283_v43 }
 0x10f   :  { %v282_v47 = vor.u32 %v281_v45, %v280_v44  ;;  %v285_v48 = vshll.u32 %v284_v46, 23  ;;  %v625_v44 = vld [vmem:[#allocation10 + $0x70] sm:$0xff]  ;;  %v626_v45 = vld [vmem:[#allocation10 + $0x78] sm:$0xff] }
 0x110   :  { %v1027_v46 = vpack.c.bf16 %v626_v45, %v625_v44 }
 0x111   :  { %v286_v49 = vor.u32 4788187, %v285_v48  ;;  %v289_v51 = vcvt.s32.f32 %v282_v47  ;;  %v732_v47 = vld [vmem:[%s1421_s6] ss:$0 sm:$0xff] }
 0x113   :  { %v287_v50 = vand.u32 2147483647, %v286_v49 }
 0x115   :  { %v290_v52 = vmul.f32 %v289_v51, %v287_v50  ;;  %v733_v51 = vld [vmem:[%s1423_s8] ss:$0 sm:$0xff] }
 0x117   :  { %v291_v54 = vxor.u32 2147483648, %v290_v52 }
 0x119   :  { %v292_v55 = vsel %vm209_vm8, %v291_v54, %v290_v52 }
 0x11a   :  { %v295_v57 = vsel %vm208_vm9, %v1363_v34, %v292_v55  ;;  %v614_v34 = vld [vmem:[#allocation10 + $0x18] sm:$0xff] }
 0x11b   :  { %1052 = vcosq.f32 %v295_v57  ;;  %v1009_v21 = vpack.c.bf16 %v614_v34, %v613_v19 }
 0x11c   :  { %1054 = vsinq.f32 %v295_v57 }
 0x125   :  { %v1053_v62 = vpop.eup %1052 }
 0x126   :  { %v1055_v63 = vpop.eup %1054  ;;  %v307_v0 = vxor.u32 2147483648, %v1053_v62 }
 0x127   :  { %v304_v2 = vxor.u32 2147483648, %v1055_v63 }
 0x128   :  { %v411_v3 = vsel %vm409_vm10, %v307_v0, %v1055_v63  ;;  %v308_v36 = vsel %vm306_vm11, %v307_v0, %v1055_v63 }
 0x129   :  { %v408_v4 = vsel %vm406_vm12, %v1053_v62, %v304_v2  ;;  %v305_v6 = vsel %vm303_vm13, %v1053_v62, %v304_v2 }
 0x12a   :  { %v412_v7 = vsel %vm405_vm14, %v408_v4, %v411_v3  ;;  %v309_v8 = vsel %vm302_vm15, %v305_v6, %v308_v36 }
 0x12b   :  { %v413_v9 = vsel %vm299_vm1, nan, %v412_v7  ;;  %v310_v11 = vsel %vm299_vm1, nan, %v309_v8 }
 0x12c   :  { %510 = vmatprep.mubr.f32.mxu1 %v413_v9 }
 0x12d   :  { %511 = vmatmul.mubr.f32.vlgmr.msra.gmra.mrb[0].mxu1 %v310_v11 }
 0x12e   :  { %922 = vmatprep.mubr.msk.f32.mxu1 %vm1205_vm0, %v1206_v10  ;;  %1007 = vmatpush3.bf16.msra.mxu1 %v1006_v20  ;;  %v617_v10 = vld [vmem:[#allocation10 + $0x30] sm:$0xff] }
 0x12f   :  { %1008 = vmatprep.subr.bf16.mxu1 %v1204_v5  ;;  %v1015_v25 = vpack.c.bf16 %v618_v24, %v617_v10 }
 0x132   :  { %1010 = vmatpush3.bf16.msra.mxu1 %v1009_v21 }
 0x133   :  { %1011 = vmatprep.subr.bf16.mxu1 %v1204_v5 }
 0x136   :  { %1013 = vmatpush3.bf16.msra.mxu1 %v1012_v1 }
 0x137   :  { %1014 = vmatprep.subr.bf16.mxu1 %v1204_v5 }
 0x13a   :  { %1016 = vmatpush3.bf16.msra.mxu1 %v1015_v25 }
 0x13b   :  { %1017 = vmatprep.subr.bf16.mxu1 %v1204_v5 }
 0x13e   :  { %1019 = vmatpush3.bf16.msra.mxu1 %v1018_v28 }
 0x13f   :  { %1020 = vmatprep.subr.bf16.mxu1 %v1204_v5 }
 0x142   :  { %1022 = vmatpush3.bf16.msra.mxu1 %v1021_v31 }
 0x143   :  { %1023 = vmatprep.subr.bf16.mxu1 %v1204_v5 }
 0x146   :  { %1025 = vmatpush3.bf16.msra.mxu1 %v1024_v35 }
 0x147   :  { %1026 = vmatprep.subr.bf16.mxu1 %v1204_v5 }
 0x14a   :  { %1028 = vmatpush3.bf16.msra.mxu1 %v1027_v46 }
 0x14f   :  { %v189_v12 = vpop.f32.mrb[0].mxu0 }
 0x150   :  { %v854_v13 = vpop.f32.mrb[1].mxu0  ;;  %v190_v38 = vadd.f32 %v722_v37, %v189_v12 }
 0x152   :  { %v193_v39 = vmax.f32 %v190_v38, 0.0 }
 0x200   :  { %v783_v40 = vpop.f32.mrb[0].mxu1 }
 0x201   :  { %v784_v41 = vpop.f32.mrb[1].mxu1 }
 0x202   :  { %v785_v42 = vadd.f32 %v784_v41, %v783_v40 }
 0x204   :  { %v516_v43 = vadd.f32 %v785_v42, %v193_v39 }
 0x206   :  { %888 = vmatmul.mubr.f32.vlgmr.msra.gmra.mrb[2].mxu0 %v516_v43 }
 0x2d9   :  { %v606_v5 = vpop.f32.mrb[2].mxu0 }
 0x2da   :  { %v607_v48 = vadd.f32 %v732_v47, %v606_v5  ;;  %v889_v49 = vpop.f32.mrb[3].mxu0 }
 0x2dc   :  { %v610_v50 = vmax.f32 %v607_v48, 0.0 }
 0x2de   :  { %923 = vmatmul.mubr.f32.vlgmr.msra.gmra.mrb[2].mxu1 %v610_v50 }
 0x3b1   :  { %v700_v52 = vpop.f32.mrb[2].mxu1 }
 0x3b2   :  { %v701_v53 = vadd.f32 %v733_v51, %v700_v52  ;;  %v924_v54 = vpop.f32.mrb[3].mxu1 }
 0x3b4   :  { %704 = vst [vmem:[#allocation11] sm:$0xff] %v701_v53 }
 0x3b5   :  { %1177 = shalt.err (!%p1174_p2)
}
 0x3b6   :  { %s1178_s10 = scalar_lea.hbm %s1424_s9, 128 }
 0x3b7   :  { %p1179_p3 = scmp.ne.s32.totalorder %s1424_s9, %s1178_s10  ;;  %p1182_p4 = scmp.lt.u32.totalorder %s1178_s10, %s1424_s9 }
 0x3b9   :  { %p1184_p5 = pnand %p1182_p4, %p1179_p3 }
 0x3bb   :  { %1187 = shalt.err (!%p1184_p5)
}
 0x3bc   :  { %714 = dma.vmem_to_hbm [thread:$0]  %s712_s12, 128, %s1424_s9, [#allocation4]  }
 0x3bd   :  { %1194 = dma.done.wait [#allocation4], 128  }
 0x3be   :  { %1195 = vsyncadd [#allocation4], 4294967168 }
 0x3bf   :  { %718 = vsyncpa [#allocation3], 1 }
 0x3c0   :  { %719 = vsyncpa [#allocation6], 1 }
 0x3c1   :  { %720 = vsyncpa [#allocation9], 1 }
 0x3c2   :  { %721 = vsyncpa [#allocation4], 1 }

</bundles_post_ra>
